<compile_context>
chip_gen: v5e
topology: v5e:2x2
jax: 0.10.0
libtpu: 0.0.40
codegen_flags: <defaults>
</compile_context>

<pallas_src>
import jax
import jax.numpy as jnp
from jax.experimental import pallas as pl
from jax.experimental.pallas import tpu as pltpu


def _make_vmf_kernel(n_valid: int, tile_n: int, blocks_per_core: int):
    eps = 1e-8
    eps_sq = eps * eps  # F.normalize clamps the norm at eps -> clamp |x|^2 at eps^2

    def kernel(packed_ref, out_ref, acc_ref):
        c = pl.program_id(0)   # core split (parallel)
        j = pl.program_id(1)   # lane tiles within this core's half (arbitrary)

        @pl.when(j == 0)
        def _():
            acc_ref[...] = jnp.zeros_like(acc_ref)

        p = packed_ref[...].astype(jnp.float32)   # (8, T) single packed stream
        tgt = p[0:3, :]                           # (3, T)
        crt = p[3:6, :]                           # (3, T)
        var = p[6:7, :]                           # (1, T)

        # Per-sample squared norms / dot product: 3-row sublane sums -> (1, T).
        s_tt = jnp.sum(tgt * tgt, axis=0, keepdims=True)
        s_oo = jnp.sum(crt * crt, axis=0, keepdims=True)
        s_to = jnp.sum(tgt * crt, axis=0, keepdims=True)

        # Fused normalization (rsqrt on the EUP, no broadcast divides).
        inv_t = jax.lax.rsqrt(jnp.maximum(s_tt, eps_sq))
        inv_o = jax.lax.rsqrt(jnp.maximum(s_oo, eps_sq))
        cosin = s_to * inv_t * inv_o              # (1, T)

        # vMF log-likelihood, two logs collapsed into one:
        #   var*cos + log(var) - log(1 - exp(-2 var)) - var
        # = var*(cos - 1) + log(var / (1 - exp(-2 var)))
        ll = var * (cosin - 1.0) + jnp.log(var / (1.0 - jnp.exp(-2.0 * var)))

        # Mask the ragged tail / fully-out-of-range (clamped) blocks.  Uses the
        # UNclamped global offset, so clamped blocks contribute exactly zero.
        # jnp.where has select semantics -> NaN/Inf in garbage lanes never leaks.
        base = (c * blocks_per_core + j) * tile_n
        col = jax.lax.broadcasted_iota(jnp.int32, (1, tile_n), 1) + base
        ll = jnp.where(col < n_valid, ll, 0.0)

        # One cross-lane reduce per tile into this core's scalar scratch.
        acc_ref[...] += jnp.sum(ll, axis=1, keepdims=True)

        @pl.when(j == pl.num_programs(1) - 1)
        def _():
            out_ref[...] = jnp.broadcast_to(acc_ref[...], out_ref.shape)

    return kernel


def vmf_distribution_loss(output, target, *, max_tile_n: int = 65536,
                          num_cores: int = 2):
    """output: dict with 'cartesian' (N,3) and 'var' (N,); target: (N,3)."""
    cart = output["cartesian"]
    var = output["var"]
    n = target.shape[0]

    dt = jnp.result_type(target.dtype, cart.dtype, var.dtype)

    # Single packing pass -> channel-major (8, N): batch on the 128-wide lane
    # axis, channels on sublanes.  (No separate pads; no dtype up-cast here.)
    packed = jnp.concatenate(
        [
            jnp.transpose(target.astype(dt)),      # rows 0..2
            jnp.transpose(cart.astype(dt)),        # rows 3..5
            jnp.reshape(var.astype(dt), (1, n)),   # row 6
            jnp.zeros((1, n), dt),                 # row 7 (sublane pad)
        ],
        axis=0,
    )

    # Lane tile: multiple of 128, capped at max_tile_n, no larger than needed.
    tile = min(max_tile_n, pl.cdiv(n, 128) * 128)
    n_blocks = pl.cdiv(n, tile)
    n_cores = max(1, min(num_cores, n_blocks))     # megacore split on v7x
    bpc = pl.cdiv(n_blocks, n_cores)
    grid = (n_cores, bpc)

    kernel = _make_vmf_kernel(n_valid=n, tile_n=tile, blocks_per_core=bpc)

    def in_map(c, j):
        # Clamp so no block index is fully out of range; clamped blocks are
        # zeroed by the in-kernel mask (which uses the unclamped offset).
        return (0, jnp.minimum(c * bpc + j, n_blocks - 1))

    out = pl.pallas_call(
        kernel,
        out_shape=jax.ShapeDtypeStruct((1, 128 * n_cores), jnp.float32),
        grid_spec=pltpu.PrefetchScalarGridSpec(
            num_scalar_prefetch=0,
            grid=grid,
            in_specs=[pl.BlockSpec((8, tile), in_map)],
            out_specs=pl.BlockSpec((1, 128), lambda c, j: (0, c)),
            scratch_shapes=[pltpu.VMEM((1, 1), jnp.float32)],
        ),
        compiler_params=pltpu.CompilerParams(
            dimension_semantics=("parallel", "arbitrary"),
        ),
    )(packed)

    per_core = out.reshape(n_cores, 128)[:, 0]     # each core's partial sum
    return -jnp.sum(per_core) / n


def _reference(output, target):
    """Pure-JAX reference matching the PyTorch module exactly."""
    eps = 1e-8
    t = target / jnp.maximum(jnp.linalg.norm(target, axis=1, keepdims=True), eps)
    o = output["cartesian"] / jnp.maximum(
        jnp.linalg.norm(output["cartesian"], axis=1, keepdims=True), eps)
    var = output["var"]
    cosin = jnp.sum(t * o, axis=1)
    ll = var * cosin + jnp.log(var) - jnp.log(1.0 - jnp.exp(-2.0 * var)) - var
    return -jnp.mean(ll)


if __name__ == "__main__":
    key = jax.random.PRNGKey(0)
    k1, k2, k3 = jax.random.split(key, 3)

    # Small batch of gaze vectors.
    N = 8
    target = jax.random.normal(k1, (N, 3), dtype=jnp.float32)
    cartesian = jax.random.normal(k2, (N, 3), dtype=jnp.float32)
    # kappa / var must be positive for the log terms (matches PyTorch assumption)
    var = jax.random.uniform(k3, (N,), dtype=jnp.float32, minval=0.5, maxval=3.0)
    output = {"cartesian": cartesian, "var": var}

    loss = jax.block_until_ready(vmf_distribution_loss(output, target))
    ref = _reference(output, target)
    assert jnp.allclose(loss, ref, rtol=1e-5, atol=1e-5), (loss, ref)

    # Exercise the multi-block / 2-core path with a ragged last block and a
    # fully-masked (clamped) trailing block by forcing a tiny tile.
    N2 = 300
    t2 = jax.random.normal(k1, (N2, 3), dtype=jnp.float32)
    c2 = jax.random.normal(k2, (N2, 3), dtype=jnp.float32)
    v2 = jax.random.uniform(k3, (N2,), dtype=jnp.float32, minval=0.5, maxval=3.0)
    out2 = {"cartesian": c2, "var": v2}
    loss2 = jax.block_until_ready(vmf_distribution_loss(out2, t2, max_tile_n=128))
    ref2 = _reference(out2, t2)
    assert jnp.allclose(loss2, ref2, rtol=1e-5, atol=1e-5), (loss2, ref2)

    print("KERNEL_OK")
</pallas_src>

<mosaic_0001>
module attributes {stable_mosaic.version = 11 : i64} {
  func.func @kernel(%arg0: i32, %arg1: i32, %arg2: memref<8x128xf32, #tpu.memory_space<vmem>>, %arg3: memref<1x128xf32, #tpu.memory_space<vmem>>, %arg4: memref<1x1xf32, #tpu.memory_space<vmem>>) attributes {dimension_semantics = [#tpu.dimension_semantics<parallel>, #tpu.dimension_semantics<arbitrary>], iteration_bounds = array<i64: 1, 1>, scalar_prefetch = 0 : i64, scratch_operands = 1 : i64, tpu.core_type = #tpu.core_type<tc>, window_params = [{transform_indices = @transform_0, window_bounds = array<i64: 8, 128>}, {transform_indices = @transform_1, window_bounds = array<i64: 1, 128>}]} {
    %c0_i32 = arith.constant 0 : i32
    %0 = arith.cmpi eq, %arg1, %c0_i32 : i32
    %1 = arith.extui %0 : i1 to i32
    %c0_i32_0 = arith.constant 0 : i32
    %2 = arith.cmpi ne, %1, %c0_i32_0 : i32
    scf.if %2 {
      %cst_17 = arith.constant 0.000000e+00 : f32
      %53 = vector.broadcast %cst_17 : f32 to vector<1x1xf32>
      %c0_18 = arith.constant 0 : index
      %c0_19 = arith.constant 0 : index
      %54 = vector.load %arg4[%c0_18, %c0_19] : memref<1x1xf32, #tpu.memory_space<vmem>>, vector<1x1xf32>
      tpu.vector_store %arg4[%c0_18, %c0_19], %53 {strides = array<i32>} : memref<1x1xf32, #tpu.memory_space<vmem>>, vector<1x1xf32>,
    } else {
    }
    %c0 = arith.constant 0 : index
    %c0_1 = arith.constant 0 : index
    %3 = vector.load %arg2[%c0, %c0_1] : memref<8x128xf32, #tpu.memory_space<vmem>>, vector<8x128xf32>
    %4 = vector.extract_strided_slice %3 {offsets = [0, 0], sizes = [3, 128], strides = [1, 1]} : vector<8x128xf32> to vector<3x128xf32>
    %5 = vector.extract_strided_slice %3 {offsets = [3, 0], sizes = [3, 128], strides = [1, 1]} : vector<8x128xf32> to vector<3x128xf32>
    %6 = vector.extract_strided_slice %3 {offsets = [6, 0], sizes = [1, 128], strides = [1, 1]} : vector<8x128xf32> to vector<1x128xf32>
    %7 = arith.mulf %4, %4 : vector<3x128xf32>
    %cst = arith.constant dense<0.000000e+00> : vector<128xf32>
    %8 = vector.multi_reduction <add>, %7, %cst [0] : vector<3x128xf32> to vector<128xf32>
    %9 = vector.shape_cast %8 : vector<128xf32> to vector<1x128xf32>
    %10 = arith.mulf %5, %5 : vector<3x128xf32>
    %cst_2 = arith.constant dense<0.000000e+00> : vector<128xf32>
    %11 = vector.multi_reduction <add>, %10, %cst_2 [0] : vector<3x128xf32> to vector<128xf32>
    %12 = vector.shape_cast %11 : vector<128xf32> to vector<1x128xf32>
    %13 = arith.mulf %4, %5 : vector<3x128xf32>
    %cst_3 = arith.constant dense<0.000000e+00> : vector<128xf32>
    %14 = vector.multi_reduction <add>, %13, %cst_3 [0] : vector<3x128xf32> to vector<128xf32>
    %15 = vector.shape_cast %14 : vector<128xf32> to vector<1x128xf32>
    %cst_4 = arith.constant 1.000000e-16 : f32
    %16 = vector.broadcast %cst_4 : f32 to vector<1x128xf32>
    %17 = arith.maximumf %9, %16 : vector<1x128xf32>
    %18 = math.rsqrt %17 : vector<1x128xf32>
    %cst_5 = arith.constant 1.000000e-16 : f32
    %19 = vector.broadcast %cst_5 : f32 to vector<1x128xf32>
    %20 = arith.maximumf %12, %19 : vector<1x128xf32>
    %21 = math.rsqrt %20 : vector<1x128xf32>
    %22 = arith.mulf %15, %18 : vector<1x128xf32>
    %23 = arith.mulf %22, %21 : vector<1x128xf32>
    %cst_6 = arith.constant 1.000000e+00 : f32
    %24 = vector.broadcast %cst_6 : f32 to vector<1x128xf32>
    %25 = arith.subf %23, %24 : vector<1x128xf32>
    %26 = arith.mulf %6, %25 : vector<1x128xf32>
    %cst_7 = arith.constant -2.000000e+00 : f32
    %27 = vector.broadcast %cst_7 : f32 to vector<1x128xf32>
    %28 = arith.mulf %27, %6 : vector<1x128xf32>
    %29 = math.exp %28 : vector<1x128xf32>
    %cst_8 = arith.constant 1.000000e+00 : f32
    %30 = vector.broadcast %cst_8 : f32 to vector<1x128xf32>
    %31 = arith.subf %30, %29 : vector<1x128xf32>
    %32 = arith.divf %6, %31 : vector<1x128xf32>
    %33 = math.log %32 : vector<1x128xf32>
    %34 = arith.addf %26, %33 : vector<1x128xf32>
    %c1_i32 = arith.constant 1 : i32
    %35 = arith.muli %arg0, %c1_i32 : i32
    %36 = arith.addi %35, %arg1 : i32
    %c128_i32 = arith.constant 128 : i32
    %37 = arith.muli %36, %c128_i32 : i32
    %38 = tpu.iota {dimensions = array<i32: 1>} : vector<1x128xi32>
    %39 = vector.broadcast %37 : i32 to vector<1x128xi32>
    %40 = arith.addi %38, %39 : vector<1x128xi32>
    %c8_i32 = arith.constant 8 : i32
    %41 = vector.broadcast %c8_i32 : i32 to vector<1x128xi32>
    %42 = arith.cmpi slt, %40, %41 : vector<1x128xi32>
    %cst_9 = arith.constant 0.000000e+00 : f32
    %43 = vector.broadcast %cst_9 : f32 to vector<1x128xf32>
    %44 = arith.select %42, %34, %43 : vector<1x128xi1>, vector<1x128xf32>
    %c0_10 = arith.constant 0 : index
    %c0_11 = arith.constant 0 : index
    %45 = vector.load %arg4[%c0_10, %c0_11] : memref<1x1xf32, #tpu.memory_space<vmem>>, vector<1x1xf32>
    %cst_12 = arith.constant dense<0.000000e+00> : vector<1xf32>
    %46 = vector.multi_reduction <add>, %44, %cst_12 [1] : vector<1x128xf32> to vector<1xf32>
    %47 = vector.shape_cast %46 : vector<1xf32> to vector<1x1xf32>
    %48 = arith.addf %45, %47 : vector<1x1xf32>
    %c0_13 = arith.constant 0 : index
    %c0_14 = arith.constant 0 : index
    %49 = vector.load %arg4[%c0_13, %c0_14] : memref<1x1xf32, #tpu.memory_space<vmem>>, vector<1x1xf32>
    tpu.vector_store %arg4[%c0_13, %c0_14], %48 {strides = array<i32>} : memref<1x1xf32, #tpu.memory_space<vmem>>, vector<1x1xf32>,
    %c0_i32_15 = arith.constant 0 : i32
    %50 = arith.cmpi eq, %arg1, %c0_i32_15 : i32
    %51 = arith.extui %50 : i1 to i32
    %c0_i32_16 = arith.constant 0 : i32
    %52 = arith.cmpi ne, %51, %c0_i32_16 : i32
    scf.if %52 {
      %c0_17 = arith.constant 0 : index
      %c0_18 = arith.constant 0 : index
      %53 = vector.load %arg4[%c0_17, %c0_18] : memref<1x1xf32, #tpu.memory_space<vmem>>, vector<1x1xf32>
      %54 = vector.shape_cast %53 : vector<1x1xf32> to vector<1x1xf32>
      %55 = vector.broadcast %54 : vector<1x1xf32> to vector<1x128xf32>
      %c0_19 = arith.constant 0 : index
      %c0_20 = arith.constant 0 : index
      %56 = vector.load %arg3[%c0_19, %c0_20] : memref<1x128xf32, #tpu.memory_space<vmem>>, vector<1x128xf32>
      tpu.vector_store %arg3[%c0_19, %c0_20], %55 {strides = array<i32>} : memref<1x128xf32, #tpu.memory_space<vmem>>, vector<1x128xf32>,
    } else {
    }
    return
  }
  func.func @transform_0(%arg0: i32, %arg1: i32) -> (i32, i32) {
    %c1_i32 = arith.constant 1 : i32
    %0 = arith.muli %arg0, %c1_i32 : i32
    %1 = arith.addi %0, %arg1 : i32
    %c0_i32 = arith.constant 0 : i32
    %2 = arith.minsi %1, %c0_i32 : i32
    %c0_i32_0 = arith.constant 0 : i32
    %c0_i32_1 = arith.constant 0 : i32
    return %c0_i32_0, %2 : i32, i32
  }
  func.func @transform_1(%arg0: i32, %arg1: i32) -> (i32, i32) {
    %c0_i32 = arith.constant 0 : i32
    %c0_i32_0 = arith.constant 0 : i32
    return %c0_i32, %arg0 : i32, i32
  }
}

</mosaic_0001>

<bundles_post_ra>
// kernel: tpu_custom_call.1
= control target key start
LH: loop header
LB: loop body
LE: loop exit
PB: predicated region body
PF: predicated region fallthrough
CT: control target
= control target key end

     0   :  { %6 = vsyncpa [#allocation4], 0  ;;  %s264_s0 = inlined_call_operand.hbm [shape: f32[8,8], index: 0, kind: input, shape index: {}]   ;;  %s265_s1 = inlined_call_operand.hbm [shape: f32[1,128], index: 1, kind: output, shape index: {}]  }
   0x1   :  { %7 = vsyncpa [#allocation5], 0  ;;  %s18_s8 = sshll.u32 %s264_s0, 4  ;;  %s233_s9 = smov [#allocation3]   ;;  %s19_s8 = int_to_ptr.hbm [resolvable:$true] %s18_s8 }
   0x2   :  { %s20_s10 = sshll.u32 %s233_s9, 4  ;;  %s21_s10 = int_to_ptr.vmem [resolvable:$true] %s20_s10 }
   0x3   :  { %23 = dma.hbm_to_vmem [thread:$0]  %s19_s8, 128, %s21_s10, [#allocation4]  }
   0x4   :  { %229 = dma.done.wait [#allocation4], 128  }
   0x5   :  { %230 = vsyncadd [#allocation4], 4294967168  ;;  %vm35_vm0 = vcmask 0   ;;  %v234_v0 = vmov 0.0   ;;  %v251_v1 = vld [vmem:[#allocation3] sm:$0xff]  ;;  %vm39_vm1 = vcmask 1042432   ;;  %v118_v57 = vlaneseq }
   0x6   :  { %36 = vst.msk [vmem:[#allocation2] sm:$0x1] %vm35_vm0, %v234_v0  ;;  %v38_v2 = vmul.f32 %v251_v1, %v251_v1  ;;  %v58_v3 = vrot.slane %v251_v1, 3  ;;  %v94_v4 = vmul.f32 -2.0, %v251_v1  ;;  %vm125_vm13 = vcmask 1046534   ;;  %s236_s0 = smov [#allocation6]  }
   0x7   :  { %v119_v62 = vand.u32 127, %v118_v57  ;;  %s151_s11 = sshll.u32 %s236_s0, 4  ;;  %s153_s14 = sshll.u32 %s265_s1, 4  ;;  %s152_s11 = int_to_ptr.vmem [resolvable:$true] %s151_s11  ;;  %s154_s14 = int_to_ptr.hbm [resolvable:$true] %s153_s14 }
   0x8   :  { %v40_v5 = vsel %vm39_vm1, %v38_v2, 0.0  ;;  %v48_v6 = vrot.slane %v38_v2, 3  ;;  %v95_v7 = vmul.f32 1.442695, %v94_v4  ;;  %v60_v10 = vmul.f32 %v58_v3, %v251_v1 }
   0x9   :  { %v41_v8 = vrot.slane %v40_v5, 4  ;;  %vm122_vm12 = vcmp.lt.s32.totalorder %v119_v62, 8 }
   0xa   :  { %v50_v9 = vsel %vm39_vm1, %v48_v6, 0.0  ;;  %171 = vpow2.f32 %v95_v7  ;;  %v61_v15 = vsel %vm39_vm1, %v60_v10, 0.0  ;;  %v235_v6 = vmov 0  }
   0xb   :  { %v42_v11 = vadd.f32 %v41_v8, %v40_v5  ;;  %v51_v12 = vrot.slane %v50_v9, 4  ;;  %v62_v21 = vrot.slane %v61_v15, 4  ;;  %170 = vset.pattern.permute.xlu0 %v235_v6 }
   0xd   :  { %v43_v13 = vrot.slane %v42_v11, 2  ;;  %v52_v14 = vadd.f32 %v51_v12, %v50_v9  ;;  %v63_v26 = vadd.f32 %v62_v21, %v61_v15  ;;  %v124_v8 = vld [vmem:[#allocation2] sm:$0x1] }
   0xf   :  { %v44_v16 = vadd.f32 %v43_v13, %v42_v11  ;;  %v53_v17 = vrot.slane %v52_v14, 2  ;;  %v64_v30 = vrot.slane %v63_v26, 2 }
  0x10   :  { %v172_v18 = vpop.eup %171 }
  0x11   :  { %v45_v19 = vrot.slane %v44_v16, 1  ;;  %v54_v20 = vadd.f32 %v53_v17, %v52_v14  ;;  %v97_v22 = vsub.f32 1.0, %v172_v18  ;;  %v65_v36 = vadd.f32 %v64_v30, %v63_v26 }
  0x13   :  { %v46_v23 = vadd.f32 %v45_v19, %v44_v16  ;;  %v55_v24 = vrot.slane %v54_v20, 1  ;;  %173 = vrcp.f32 %v97_v22  ;;  %v109_v32 = vand.u32 2147483648, %v97_v22 }
  0x14   :  { %vm103_vm2 = vweird.f32 %v97_v22  ;;  %v107_v34 = vand.u32 2147483647, %v97_v22  ;;  %v66_v44 = vrot.slane %v65_v36, 1 }
  0x15   :  { %v56_v25 = vadd.f32 %v55_v24, %v54_v20  ;;  %v68_v27 = vmax.f32 %v46_v23, 1e-16  ;;  %v110_v40 = vor.u32 1.1754944e-38, %v109_v32 }
  0x16   :  { %vm108_vm5 = vcmp.eq.f32.partialorder %v107_v34, 8.507059e+37  ;;  %v67_v52 = vadd.f32 %v66_v44, %v65_v36 }
  0x17   :  { %175 = vrsqrt.f32 %v68_v27  ;;  %v79_v28 = vmax.f32 %v56_v25, 1e-16  ;;  %vm75_vm6 = vweird.f32 %v68_v27 }
  0x19   :  { %v174_v29 = vpop.eup %173  ;;  %177 = vrsqrt.f32 %v79_v28  ;;  %vm86_vm8 = vweird.f32 %v79_v28 }
  0x1a   :  { %v99_v31 = vmul.f32 %v174_v29, %v97_v22  ;;  %vm104_vm3 = vweird.f32 %v174_v29 }
  0x1b   :  { %vm105_vm4 = vmor %vm103_vm2, %vm104_vm3 }
  0x1c   :  { %v100_v33 = vsub.f32 1.0, %v99_v31 }
  0x1d   :  { %v176_v35 = vpop.eup %175 }
  0x1e   :  { %v70_v37 = vmul.f32 %v176_v35, %v68_v27  ;;  %v101_v38 = vmul.f32 %v174_v29, %v100_v33  ;;  %vm76_vm7 = vweird.f32 %v176_v35 }
  0x1f   :  { %v178_v39 = vpop.eup %177  ;;  %vm77_vm10 = vmor %vm75_vm6, %vm76_vm7 }
  0x20   :  { %v71_v41 = vmul.f32 %v176_v35, %v70_v37  ;;  %v81_v42 = vmul.f32 %v178_v39, %v79_v28  ;;  %v102_v43 = vadd.f32 %v174_v29, %v101_v38  ;;  %vm87_vm9 = vweird.f32 %v178_v39 }
  0x21   :  { %vm88_vm11 = vmor %vm86_vm8, %vm87_vm9 }
  0x22   :  { %v72_v45 = vmul.f32 0.5, %v71_v41  ;;  %v82_v46 = vmul.f32 %v178_v39, %v81_v42  ;;  %v106_v47 = vsel %vm105_vm4, %v174_v29, %v102_v43 }
  0x23   :  { %v111_v48 = vsel %vm108_vm5, %v110_v40, %v106_v47 }
  0x24   :  { %v73_v49 = vsub.f32 1.5, %v72_v45  ;;  %v83_v50 = vmul.f32 0.5, %v82_v46  ;;  %v112_v51 = vmul.f32 %v111_v48, %v251_v1 }
  0x26   :  { %v74_v53 = vmul.f32 %v176_v35, %v73_v49  ;;  %v84_v54 = vsub.f32 1.5, %v83_v50  ;;  %179 = vlog2.f32 %v112_v51 }
  0x28   :  { %v78_v55 = vsel %vm77_vm10, %v176_v35, %v74_v53  ;;  %v85_v56 = vmul.f32 %v178_v39, %v84_v54 }
  0x29   :  { %v90_v58 = vmul.f32 %v78_v55, %v67_v52 }
  0x2a   :  { %v89_v59 = vsel %vm88_vm11, %v178_v39, %v85_v56 }
  0x2b   :  { %v91_v60 = vmul.f32 %v90_v58, %v89_v59 }
  0x2c   :  { %v180_v61 = vpop.eup %179 }
  0x2d   :  { %v165_v63 = vadd.f32 -1.0, %v91_v60  ;;  %v114_v0 = vmul.f32 0.6931472, %v180_v61 }
  0x2f   :  { %v93_v2 = vmul.f32 %v165_v63, %v251_v1 }
  0x31   :  { %v115_v3 = vadd.f32 %v114_v0, %v93_v2 }
  0x33   :  { %v123_v4 = vsel %vm122_vm12, %v115_v3, 0.0 }
  0x34   :  { %v126_v5 = vsel %vm125_vm13, %v123_v4, 0.0 }
  0x35   :  { %127 = vadd.xlane.f32.xlu0 %v126_v5 }
  0xa8   :  { %v128_v7 = vpop.xlane.xlu0 %127 }
  0xa9   :  { %v130_v9 = vperm.slane %v128_v7, 6 }
  0xab   :  { %v132_v10 = vadd.f32 %v130_v9, %v124_v8 }
  0xad   :  { %134 = vst.msk [vmem:[#allocation2] sm:$0x1] %vm35_vm0, %v132_v10 }
  0xb4   :  { %v138_v11 = vld [vmem:[#allocation2] sm:$0x1] }
  0xb5   :  { %141 = vperm.xlu0 %170, %v138_v11  }
 0x127   :  { %v142_v1 = vpop.permute.xlu0 %141 }
 0x128   :  { %v144_v12 = vperm.slane %v142_v1, 0 }
 0x12a   :  { %145 = vst [vmem:[#allocation6] sm:$0x1] %v144_v12 }
 0x12b   :  { %156 = dma.vmem_to_hbm [thread:$0]  %s152_s11, 16, %s154_s14, [#allocation5]  }
 0x12c   :  { %231 = dma.done.wait [#allocation5], 16  }
 0x12d   :  { %232 = vsyncadd [#allocation5], 4294967280 }
 0x12e   :  { %161 = vsyncpa [#allocation4], 1 }
 0x12f   :  { %162 = vsyncpa [#allocation5], 1 }

</bundles_post_ra>
